<compile_context>
chip_gen: v7x
topology: tpu7x:2x2x1
jax: 0.10.0
libtpu: 0.0.40
codegen_flags: <defaults>
</compile_context>

<pallas_src>
import jax
import jax.numpy as jnp
from jax.experimental import pallas as pl
from jax.experimental.pallas import tpu as pltpu

INPUT_DIM = 3
NUM_CLASSES = 6
HIDDEN_DIM = 64
NUM_HEADS = 3          # head_dim = 1, seq_len = 1 -> attention is identity on v


def emotion_classifier_kernel(
    x_ref,      # (TB, 3)         f32
    wa_ref,     # (3, 64)         f32   folded  wv @ wo @ w1
    ba_ref,     # (1, 64)         f32   folded  (bv@wo + bo) @ w1 + b1
    w2_ref,     # (64, 64)        bf16
    b2_ref,     # (1, 64)         f32
    w3_ref,     # (64, 6)         bf16
    b3_ref,     # (1, 6)          f32
    out_ref,    # (TB, 6)         f32
):
    x = x_ref[...]

    # ---- layer 1: relu(x @ W_a + b_a) -----------------------------------
    # K=3 contraction as 3 VPU broadcast MACs (keeps the MXU for the 64-deep
    # matmuls instead of a >97%-padded K=3 push).
    h1 = (x[:, 0:1] * wa_ref[0:1, :]
          + x[:, 1:2] * wa_ref[1:2, :]
          + x[:, 2:3] * wa_ref[2:3, :]
          + ba_ref[...])
    h1 = jnp.maximum(h1, 0.0)

    # ---- layer 2: relu(h1 @ w2 + b2)  (bf16 MXU, f32 accumulate) ---------
    h2 = jnp.maximum(
        jnp.dot(h1.astype(jnp.bfloat16), w2_ref[...],
                preferred_element_type=jnp.float32)
        + b2_ref[...], 0.0)

    # ---- layer 3: h2 @ w3 + b3  (bf16 MXU, f32 accumulate, narrow store) --
    logits = (jnp.dot(h2.astype(jnp.bfloat16), w3_ref[...],
                      preferred_element_type=jnp.float32)
              + b3_ref[...])

    out_ref[...] = logits.astype(out_ref.dtype)


def prepare_params(params):
    """One-time (per weight set) preprocessing: fold the seq_len==1 attention
    into FC layer 1 and cast the MXU weights to bf16.  Call once and reuse the
    result across forward calls."""
    #   attn_out = x @ wv @ wo + (bv @ wo + bo)          (softmax over 1 key == 1)
    #   h1_pre   = attn_out @ w1 + b1
    #            = x @ (wv @ wo @ w1) + ((bv @ wo + bo) @ w1 + b1)
    wa = params["wv"] @ params["wo"] @ params["w1"]
    ba = (params["bv"] @ params["wo"] + params["bo"]) @ params["w1"] + params["b1"]
    return dict(
        wa=wa.astype(jnp.float32),                 # (3, 64)
        ba=ba.astype(jnp.float32),                 # (1, 64)
        w2=params["w2"].astype(jnp.bfloat16),      # (64, 64)
        b2=params["b2"].astype(jnp.float32),       # (1, 64)
        w3=params["w3"].astype(jnp.bfloat16),      # (64, 6)
        b3=params["b3"].astype(jnp.float32),       # (1, 6)
    )


def _pick_tb(batch):
    """Batch tile: full batch for small B; otherwise >=2 grid steps (so the
    'parallel' axis can shard across v7x's two TensorCores), 8-aligned,
    capped at 2048 (safe under v5e's 16 MiB default scoped VMEM; we raise the
    limit anyway for tb>1024)."""
    if batch <= 512:
        return batch
    tb = min(2048, pl.cdiv(batch, 2))
    return max(8, ((tb + 7) // 8) * 8)


def emotion_classifier(x, prepared, *, tb=None):
    """x: (B, 3) f32; prepared: output of prepare_params().  Returns (B, 6)."""
    B = x.shape[0]
    if tb is None:
        tb = _pick_tb(B)

    grid = (pl.cdiv(B, tb),)

    # Weights/biases: full-array blocks with index_map -> (0, 0) so they stay
    # VMEM-resident across all grid steps (DMA'd once).
    def resident(shape):
        return pl.BlockSpec(shape, lambda i: (0, 0))

    # Advisory cost estimate so XLA can overlap the call with surrounding ops.
    flops = 2 * B * (INPUT_DIM * HIDDEN_DIM
                     + HIDDEN_DIM * HIDDEN_DIM
                     + HIDDEN_DIM * NUM_CLASSES)
    weight_bytes = (INPUT_DIM * HIDDEN_DIM * 4 + HIDDEN_DIM * 4
                    + HIDDEN_DIM * HIDDEN_DIM * 2 + HIDDEN_DIM * 4
                    + HIDDEN_DIM * NUM_CLASSES * 2 + NUM_CLASSES * 4)
    bytes_accessed = B * INPUT_DIM * 4 + B * NUM_CLASSES * 4 + weight_bytes
    cost = pl.CostEstimate(flops=flops, transcendentals=0,
                           bytes_accessed=bytes_accessed)

    cp_kwargs = dict(dimension_semantics=("parallel",))   # shards across v7x dual TC
    if tb > 1024:
        cp_kwargs["vmem_limit_bytes"] = 32 << 20           # headroom on v5e defaults

    out = pl.pallas_call(
        emotion_classifier_kernel,
        out_shape=jax.ShapeDtypeStruct((B, NUM_CLASSES), jnp.float32),
        grid=grid,
        in_specs=[
            pl.BlockSpec((tb, INPUT_DIM), lambda i: (i, 0)),     # x (batch-tiled)
            resident((INPUT_DIM, HIDDEN_DIM)),                   # wa
            resident((1, HIDDEN_DIM)),                           # ba
            resident((HIDDEN_DIM, HIDDEN_DIM)),                  # w2 (bf16)
            resident((1, HIDDEN_DIM)),                           # b2
            resident((HIDDEN_DIM, NUM_CLASSES)),                 # w3 (bf16)
            resident((1, NUM_CLASSES)),                          # b3
        ],
        out_specs=pl.BlockSpec((tb, NUM_CLASSES), lambda i: (i, 0)),
        compiler_params=pltpu.CompilerParams(**cp_kwargs),
        cost_estimate=cost,
    )(x, prepared["wa"], prepared["ba"], prepared["w2"], prepared["b2"],
      prepared["w3"], prepared["b3"])

    return out


def init_params(key):
    """Deterministic synthetic parameters (PyTorch-like uniform init)."""
    D, H, C = INPUT_DIM, HIDDEN_DIM, NUM_CLASSES
    ks = jax.random.split(key, 12)

    def u(k, shape, fan_in):
        bound = 1.0 / jnp.sqrt(jnp.float32(fan_in))
        return jax.random.uniform(k, shape, jnp.float32, -bound, bound)

    return dict(
        # MultiheadAttention: in_proj (q/k/v) and out_proj; biases init to 0
        # as in PyTorch.  Stored as (in, out) == pre-transposed.
        wq=u(ks[0], (D, D), D), bq=jnp.zeros((1, D), jnp.float32),
        wk=u(ks[1], (D, D), D), bk=jnp.zeros((1, D), jnp.float32),
        wv=u(ks[2], (D, D), D), bv=jnp.zeros((1, D), jnp.float32),
        wo=u(ks[3], (D, D), D), bo=jnp.zeros((1, D), jnp.float32),
        # fc stack
        w1=u(ks[4], (D, H), D), b1=u(ks[5], (1, H), D),
        w2=u(ks[6], (H, H), H), b2=u(ks[7], (1, H), H),
        w3=u(ks[8], (H, C), H), b3=u(ks[9], (1, C), H),
    )


def reference(x, p):
    """Pure-JAX f32 reference of the PyTorch forward (seq_len == 1)."""
    # softmax over a single key == 1  =>  attention output == v/out projection
    v = x @ p["wv"] + p["bv"]
    a = v @ p["wo"] + p["bo"]
    h = jnp.maximum(a @ p["w1"] + p["b1"], 0.0)
    h = jnp.maximum(h @ p["w2"] + p["b2"], 0.0)
    return h @ p["w3"] + p["b3"]


if __name__ == "__main__":
    key = jax.random.PRNGKey(0)
    pkey, xkey = jax.random.split(key)
    params = init_params(pkey)

    # One-time fold/cast (hoisted out of the per-call path).
    prepared = prepare_params(params)
    prepared = jax.tree_util.tree_map(jax.block_until_ready, prepared)

    B = 8
    x = jax.random.normal(xkey, (B, INPUT_DIM), jnp.float32)

    out = emotion_classifier(x, prepared)
    jax.block_until_ready(out)

    assert out.shape == (B, NUM_CLASSES), out.shape
    ref = reference(x, params)
    # Tolerance loosened for bf16 MXU operands (f32 accumulation).
    assert jnp.allclose(out, ref, rtol=2e-2, atol=2e-2), (out, ref)

    print("KERNEL_OK")
</pallas_src>

<mosaic_0001>
module attributes {stable_mosaic.version = 11 : i64} {
  func.func @emotion_classifier_kernel(%arg0: i32, %arg1: memref<8x3xf32, #tpu.memory_space<vmem>>, %arg2: memref<3x64xf32, #tpu.memory_space<vmem>>, %arg3: memref<1x64xf32, #tpu.memory_space<vmem>>, %arg4: memref<64x64xbf16, #tpu.memory_space<vmem>>, %arg5: memref<1x64xf32, #tpu.memory_space<vmem>>, %arg6: memref<64x6xbf16, #tpu.memory_space<vmem>>, %arg7: memref<1x6xf32, #tpu.memory_space<vmem>>, %arg8: memref<8x6xf32, #tpu.memory_space<vmem>>) attributes {dimension_semantics = [#tpu.dimension_semantics<parallel>], iteration_bounds = array<i64: 1>, scalar_prefetch = 0 : i64, scratch_operands = 0 : i64, tpu.core_type = #tpu.core_type<tc>, window_params = [{transform_indices = @transform_0, window_bounds = array<i64: 8, 3>}, {pipeline_mode = #tpu.pipeline_mode<synchronous>, transform_indices = @transform_1, window_bounds = array<i64: 3, 64>}, {pipeline_mode = #tpu.pipeline_mode<synchronous>, transform_indices = @transform_2, window_bounds = array<i64: 1, 64>}, {pipeline_mode = #tpu.pipeline_mode<synchronous>, transform_indices = @transform_3, window_bounds = array<i64: 64, 64>}, {pipeline_mode = #tpu.pipeline_mode<synchronous>, transform_indices = @transform_4, window_bounds = array<i64: 1, 64>}, {pipeline_mode = #tpu.pipeline_mode<synchronous>, transform_indices = @transform_5, window_bounds = array<i64: 64, 6>}, {pipeline_mode = #tpu.pipeline_mode<synchronous>, transform_indices = @transform_6, window_bounds = array<i64: 1, 6>}, {transform_indices = @transform_7, window_bounds = array<i64: 8, 6>}]} {
    %c0 = arith.constant 0 : index
    %c0_0 = arith.constant 0 : index
    %0 = vector.load %arg1[%c0, %c0_0] : memref<8x3xf32, #tpu.memory_space<vmem>>, vector<8x3xf32>
    %1 = vector.extract_strided_slice %0 {offsets = [0, 0], sizes = [8, 1], strides = [1, 1]} : vector<8x3xf32> to vector<8x1xf32>
    %c0_1 = arith.constant 0 : index
    %c0_2 = arith.constant 0 : index
    %2 = vector.load %arg2[%c0_1, %c0_2] : memref<3x64xf32, #tpu.memory_space<vmem>>, vector<1x64xf32>
    %3 = vector.broadcast %1 : vector<8x1xf32> to vector<8x64xf32>
    %4 = vector.broadcast %2 : vector<1x64xf32> to vector<8x64xf32>
    %5 = arith.mulf %3, %4 : vector<8x64xf32>
    %6 = vector.extract_strided_slice %0 {offsets = [0, 1], sizes = [8, 1], strides = [1, 1]} : vector<8x3xf32> to vector<8x1xf32>
    %c1 = arith.constant 1 : index
    %c0_3 = arith.constant 0 : index
    %7 = vector.load %arg2[%c1, %c0_3] : memref<3x64xf32, #tpu.memory_space<vmem>>, vector<1x64xf32>
    %8 = vector.broadcast %6 : vector<8x1xf32> to vector<8x64xf32>
    %9 = vector.broadcast %7 : vector<1x64xf32> to vector<8x64xf32>
    %10 = arith.mulf %8, %9 : vector<8x64xf32>
    %11 = arith.addf %5, %10 : vector<8x64xf32>
    %12 = vector.extract_strided_slice %0 {offsets = [0, 2], sizes = [8, 1], strides = [1, 1]} : vector<8x3xf32> to vector<8x1xf32>
    %c2 = arith.constant 2 : index
    %c0_4 = arith.constant 0 : index
    %13 = vector.load %arg2[%c2, %c0_4] : memref<3x64xf32, #tpu.memory_space<vmem>>, vector<1x64xf32>
    %14 = vector.broadcast %12 : vector<8x1xf32> to vector<8x64xf32>
    %15 = vector.broadcast %13 : vector<1x64xf32> to vector<8x64xf32>
    %16 = arith.mulf %14, %15 : vector<8x64xf32>
    %17 = arith.addf %11, %16 : vector<8x64xf32>
    %c0_5 = arith.constant 0 : index
    %c0_6 = arith.constant 0 : index
    %18 = vector.load %arg3[%c0_5, %c0_6] : memref<1x64xf32, #tpu.memory_space<vmem>>, vector<1x64xf32>
    %19 = vector.broadcast %18 : vector<1x64xf32> to vector<8x64xf32>
    %20 = arith.addf %17, %19 : vector<8x64xf32>
    %cst = arith.constant 0.000000e+00 : f32
    %21 = vector.broadcast %cst : f32 to vector<8x64xf32>
    %22 = arith.maximumf %20, %21 : vector<8x64xf32>
    %23 = arith.truncf %22 : vector<8x64xf32> to vector<8x64xbf16>
    %c0_7 = arith.constant 0 : index
    %c0_8 = arith.constant 0 : index
    %24 = vector.load %arg4[%c0_7, %c0_8] : memref<64x64xbf16, #tpu.memory_space<vmem>>, vector<64x64xbf16>
    %cst_9 = arith.constant dense<0.000000e+00> : vector<8x64xf32>
    %25 = tpu.matmul %23, %24, %cst_9 {dimension_numbers = #tpu.dot_dimension_numbers<[1], [0], [0], [1], [0, 0, 1, 1], [], []>} : vector<8x64xbf16>, vector<64x64xbf16>, vector<8x64xf32> -> vector<8x64xf32>
    %c0_10 = arith.constant 0 : index
    %c0_11 = arith.constant 0 : index
    %26 = vector.load %arg5[%c0_10, %c0_11] : memref<1x64xf32, #tpu.memory_space<vmem>>, vector<1x64xf32>
    %27 = vector.broadcast %26 : vector<1x64xf32> to vector<8x64xf32>
    %28 = arith.addf %25, %27 : vector<8x64xf32>
    %cst_12 = arith.constant 0.000000e+00 : f32
    %29 = vector.broadcast %cst_12 : f32 to vector<8x64xf32>
    %30 = arith.maximumf %28, %29 : vector<8x64xf32>
    %31 = arith.truncf %30 : vector<8x64xf32> to vector<8x64xbf16>
    %c0_13 = arith.constant 0 : index
    %c0_14 = arith.constant 0 : index
    %32 = vector.load %arg6[%c0_13, %c0_14] : memref<64x6xbf16, #tpu.memory_space<vmem>>, vector<64x6xbf16>
    %cst_15 = arith.constant dense<0.000000e+00> : vector<8x6xf32>
    %33 = tpu.matmul %31, %32, %cst_15 {dimension_numbers = #tpu.dot_dimension_numbers<[1], [0], [0], [1], [0, 0, 1, 1], [], []>} : vector<8x64xbf16>, vector<64x6xbf16>, vector<8x6xf32> -> vector<8x6xf32>
    %c0_16 = arith.constant 0 : index
    %c0_17 = arith.constant 0 : index
    %34 = vector.load %arg7[%c0_16, %c0_17] : memref<1x6xf32, #tpu.memory_space<vmem>>, vector<1x6xf32>
    %35 = vector.broadcast %34 : vector<1x6xf32> to vector<8x6xf32>
    %36 = arith.addf %33, %35 : vector<8x6xf32>
    %c0_18 = arith.constant 0 : index
    %c0_19 = arith.constant 0 : index
    %37 = vector.load %arg8[%c0_18, %c0_19] : memref<8x6xf32, #tpu.memory_space<vmem>>, vector<8x6xf32>
    tpu.vector_store %arg8[%c0_18, %c0_19], %36 {strides = array<i32>} : memref<8x6xf32, #tpu.memory_space<vmem>>, vector<8x6xf32>,
    return
  }
  func.func @transform_0(%arg0: i32) -> (i32, i32) {
    %c0_i32 = arith.constant 0 : i32
    %c0_i32_0 = arith.constant 0 : i32
    return %arg0, %c0_i32 : i32, i32
  }
  func.func @transform_1(%arg0: i32) -> (i32, i32) {
    %c0_i32 = arith.constant 0 : i32
    %c0_i32_0 = arith.constant 0 : i32
    %c0_i32_1 = arith.constant 0 : i32
    return %c0_i32, %c0_i32_0 : i32, i32
  }
  func.func @transform_2(%arg0: i32) -> (i32, i32) {
    %c0_i32 = arith.constant 0 : i32
    %c0_i32_0 = arith.constant 0 : i32
    %c0_i32_1 = arith.constant 0 : i32
    return %c0_i32, %c0_i32_0 : i32, i32
  }
  func.func @transform_3(%arg0: i32) -> (i32, i32) {
    %c0_i32 = arith.constant 0 : i32
    %c0_i32_0 = arith.constant 0 : i32
    %c0_i32_1 = arith.constant 0 : i32
    return %c0_i32, %c0_i32_0 : i32, i32
  }
  func.func @transform_4(%arg0: i32) -> (i32, i32) {
    %c0_i32 = arith.constant 0 : i32
    %c0_i32_0 = arith.constant 0 : i32
    %c0_i32_1 = arith.constant 0 : i32
    return %c0_i32, %c0_i32_0 : i32, i32
  }
  func.func @transform_5(%arg0: i32) -> (i32, i32) {
    %c0_i32 = arith.constant 0 : i32
    %c0_i32_0 = arith.constant 0 : i32
    %c0_i32_1 = arith.constant 0 : i32
    return %c0_i32, %c0_i32_0 : i32, i32
  }
  func.func @transform_6(%arg0: i32) -> (i32, i32) {
    %c0_i32 = arith.constant 0 : i32
    %c0_i32_0 = arith.constant 0 : i32
    %c0_i32_1 = arith.constant 0 : i32
    return %c0_i32, %c0_i32_0 : i32, i32
  }
  func.func @transform_7(%arg0: i32) -> (i32, i32) {
    %c0_i32 = arith.constant 0 : i32
    %c0_i32_0 = arith.constant 0 : i32
    return %arg0, %c0_i32 : i32, i32
  }
}

</mosaic_0001>

<bundles_post_ra>
// kernel: tpu_custom_call.1
= control target key start
LH: loop header
LB: loop body
LE: loop exit
PB: predicated region body
PF: predicated region fallthrough
CT: control target
= control target key end

     0   :  { %v347_v1 = vmov 0   ;;  %v348_v2 = vmov 2   ;;  %v349_v4 = vmov 0.0   ;;  %v350_v5 = vmov 1   ;;  %s452_s0 = inlined_call_operand.vmem [shape: f32[8,3], index: 0, kind: input, shape index: {}]   ;;  %s453_s1 = inlined_call_operand.vmem [shape: f32[3,64], index: 1, kind: input, shape index: {}]   ;;  %s454_s2 = inlined_call_operand.vmem [shape: f32[1,64], index: 2, kind: input, shape index: {}]   ;;  %s455_s3 = inlined_call_operand.vmem [shape: bf16[64,64], index: 3, kind: input, shape index: {}]   ;;  %s456_s4 = inlined_call_operand.vmem [shape: f32[1,64], index: 4, kind: input, shape index: {}]   ;;  %s457_s5 = inlined_call_operand.vmem [shape: bf16[64,6], index: 5, kind: input, shape index: {}]   ;;  %s458_s6 = inlined_call_operand.vmem [shape: f32[1,6], index: 6, kind: input, shape index: {}]   ;;  %s459_s7 = inlined_call_operand.hbm [shape: f32[8,6], index: 7, kind: output, shape index: {}]  }
   0x1   :  { %v28_v0 = vld [vmem:[%s452_s0] sm:$0xff]  ;;  %311 = vset.pattern.permute.xlu0 %v347_v1  ;;  %313 = vset.pattern.permute.xlu1 %v348_v2  ;;  %v316_v6 = vld [vmem:[%s455_s3 + $0x8] sm:$0xff]  }
   0x2   :  { %32 = vperm.xlu0 %311, %v28_v0   ;;  %53 = vperm.xlu1 %313, %v28_v0   ;;  %v315_v3 = vld [vmem:[%s455_s3] sm:$0xff]  }
   0x3   :  { %281 = vmatprep.subr.bf16.mxu0 %v349_v4  ;;  %293 = vmatprep.subr.bf16.mxu1 %v349_v4 }
   0x4   :  { %282 = vmatpush3.bf16.msra.mxu0 %v315_v3 }
   0x5   :  { %283 = vmatprep.subr.bf16.mxu0 %v349_v4 }
   0x6   :  { %312 = vset.pattern.permute.xlu0 %v350_v5 }
   0x7   :  { %42 = vperm.xlu0 %312, %v28_v0  }
   0x8   :  { %12 = vsyncpa [#allocation3], 0  ;;  %284 = vmatpush3.bf16.msra.mxu0 %v316_v6  ;;  %v317_v7 = vld [vmem:[%s455_s3 + $0x10] sm:$0xff]   ;;  %v318_v8 = vld [vmem:[%s455_s3 + $0x18] sm:$0xff]   ;;  %vm351_vm0 = vmmov 0   ;;  %vm111_vm1 = vcmask 523264  }
   0x9   :  { %285 = vmatprep.subr.bf16.mxu0 %v349_v4  ;;  %289 = vmatprep.mubr.msk.bf16.mxu0 %vm351_vm0, %v349_v4  ;;  %v319_v9 = vld [vmem:[%s457_s5] sm:$0xff]   ;;  %v320_v10 = vld [vmem:[%s457_s5 + $0x8] sm:$0xff]   ;;  %v321_v26 = vld [vmem:[%s457_s5 + $0x10] sm:$0xff]   ;;  %s352_s27 = smov [#allocation2]   ;;  %vm239_vm2 = vcmask 48128  }
   0xa   :  { %301 = vmatprep.mubr.msk.bf16.mxu1 %vm351_vm0, %v349_v4  ;;  %294 = vmatpush3.bf16.msra.mxu1 %v319_v9  ;;  %v255_v12 = vld [vmem:[%s453_s1] ss:$0 sm:$0xff]  ;;  %v256_v13 = vld [vmem:[%s453_s1 + $0x1] ss:$0 sm:$0xff]  ;;  %v257_v14 = vld [vmem:[%s453_s1 + $0x2] ss:$0 sm:$0xff] }
   0xb   :  { %314 = vset.pattern.permute.xlu0 %v348_v2  ;;  %295 = vmatprep.subr.bf16.mxu1 %v349_v4  ;;  %v258_v21 = vld [vmem:[%s454_s2] ss:$0 sm:$0xff]  ;;  %v322_v27 = vld [vmem:[%s457_s5 + $0x18] sm:$0xff]   ;;  %s247_s5 = sshll.u32 %s352_s27, 4  ;;  %s248_s5 = int_to_ptr.vmem [resolvable:$true] %s247_s5 }
   0xc   :  { %286 = vmatpush3.bf16.msra.mxu0 %v317_v7  ;;  %v259_v28 = vld [vmem:[%s456_s4] ss:$0 sm:$0xff]  ;;  %s323_s4 = scalar_lea.vmem %s248_s5, 128  ;;  %p328_p1 = scmp.lt.s32.totalorder %s248_s5, %s248_s5 }
   0xd   :  { %287 = vmatprep.subr.bf16.mxu0 %v349_v4  ;;  %v265_v36 = vld [vmem:[%s458_s6] ss:$0 sm:$0xff]  ;;  %p324_p0 = scmp.ne.s32.totalorder %s248_s5, %s323_s4  ;;  %p329_p2 = scmp.lt.s32.totalorder %s323_s4, %s323_s4 }
   0xe   :  { %296 = vmatpush3.bf16.msra.mxu1 %v320_v10 }
   0xf   :  { %297 = vmatprep.subr.bf16.mxu1 %v349_v4  ;;  %p330_p3 = por %p329_p2, %p328_p1 }
  0x10   :  { %288 = vmatpush3.bf16.msra.mxu0 %v318_v8 }
  0x11   :  { %p331_p4 = pnand %p330_p3, %p324_p0 }
  0x12   :  { %298 = vmatpush3.bf16.msra.mxu1 %v321_v26 }
  0x13   :  { %299 = vmatprep.subr.bf16.mxu1 %v349_v4 }
  0x16   :  { %300 = vmatpush3.bf16.msra.mxu1 %v322_v27 }
  0x81   :  { %v33_v11 = vpop.permute.xlu0 %32  ;;  %v54_v15 = vpop.permute.xlu1 %53 }
  0x82   :  { %v39_v17 = vmul.f32 %v255_v12, %v33_v11  ;;  %v60_v19 = vmul.f32 %v257_v14, %v54_v15 }
  0x86   :  { %v43_v16 = vpop.permute.xlu0 %42 }
  0x87   :  { %v49_v18 = vmul.f32 %v256_v13, %v43_v16 }
  0x89   :  { %v50_v20 = vadd.f32 %v49_v18, %v39_v17 }
  0x8b   :  { %v61_v22 = vadd.f32 %v60_v19, %v50_v20 }
  0x8d   :  { %v69_v23 = vadd.f32 %v258_v21, %v61_v22 }
  0x8f   :  { %v70_v24 = vmax.f32 %v69_v23, 0.0 }
  0x91   :  { %v71_v25 = vpack.c.bf16 %v70_v24, %v70_v24 }
  0x93   :  { %290 = vmatmul.mubr.msk.bf16.vlgmr.msra.gmra.mrb[0].mxu0 %vm111_vm1, %v71_v25 }
 0x166   :  { %v149_v29 = vpop.f32.mrb[0].mxu0 }
 0x167   :  { %v150_v30 = vadd.f32 %v259_v28, %v149_v29  ;;  %v291_v31 = vpop.f32.mrb[1].mxu0 }
 0x168   :  { %v152_v32 = vpop.f32.mrb[2].mxu0 }
 0x169   :  { %v155_v33 = vmax.f32 %v150_v30, 0.0  ;;  %v292_v34 = vpop.f32.mrb[3].mxu0 }
 0x16b   :  { %v156_v35 = vpack.c.bf16 %v155_v33, %v155_v33 }
 0x16d   :  { %302 = vmatmul.mubr.msk.bf16.vlgmr.msra.gmra.mrb[0].mxu1 %vm111_vm1, %v156_v35 }
 0x240   :  { %v233_v37 = vpop.f32.mrb[0].mxu1 }
 0x241   :  { %v234_v38 = vadd.f32 %v265_v36, %v233_v37  ;;  %v303_v39 = vpop.f32.mrb[1].mxu1 }
 0x242   :  { %v236_v40 = vpop.f32.mrb[2].mxu1 }
 0x243   :  { %v304_v41 = vpop.f32.mrb[3].mxu1  ;;  %240 = vst.msk [vmem:[#allocation2] sm:$0xff] %vm239_vm2, %v234_v38 }
 0x244   :  { %334 = shalt.err (!%p331_p4)
}
 0x245   :  { %s335_s6 = scalar_lea.hbm %s459_s7, 128 }
 0x246   :  { %p336_p5 = scmp.ne.s32.totalorder %s459_s7, %s335_s6  ;;  %p339_p6 = scmp.lt.u32.totalorder %s335_s6, %s459_s7 }
 0x248   :  { %p341_p7 = pnand %p339_p6, %p336_p5 }
 0x24a   :  { %344 = shalt.err (!%p341_p7)
}
 0x24b   :  { %250 = dma.vmem_to_hbm [thread:$0]  %s248_s5, 128, %s459_s7, [#allocation3]  }
 0x24c   :  { %345 = dma.done.wait [#allocation3], 128  }
 0x24d   :  { %346 = vsyncadd [#allocation3], 4294967168 }
 0x24e   :  { %254 = vsyncpa [#allocation3], 1 }

</bundles_post_ra>
